<compile_context>
chip_gen: v5e
topology: v5e:2x2
jax: 0.10.0
libtpu: 0.0.40
codegen_flags: <defaults>
</compile_context>

<pallas_src>
import functools

import jax
import jax.numpy as jnp
from jax.experimental import pallas as pl
from jax.experimental.pallas import tpu as pltpu


# ----------------------------------------------------------------------------
# Pallas kernel: fused matmul + bias + residual add + ReLU6
# ----------------------------------------------------------------------------
def _fused_matmul_add_relu6_kernel(p_ref, w_ref, b_ref, y_ref, o_ref):
    # p_ref: (TM, K)        deformed-im2col patch tile (compute dtype)
    # w_ref: (K, Cout_p)    full weight matrix, resident in VMEM (compute dtype)
    # b_ref: (1, Cout_p)    bias, f32
    # y_ref: (TM, Cout_p)   residual x2 tile (compute dtype)
    # o_ref: (TM, Cout_p)   output tile
    acc = jnp.dot(p_ref[...], w_ref[...], preferred_element_type=jnp.float32)
    acc = acc + b_ref[...] + y_ref[...].astype(jnp.float32)
    acc = jnp.minimum(jnp.maximum(acc, 0.0), 6.0)  # ReLU6
    o_ref[...] = acc.astype(o_ref.dtype)


# ----------------------------------------------------------------------------
# JAX glue: deformable bilinear sampling -> patch matrix (torchvision semantics)
# ----------------------------------------------------------------------------
def _bilinear_gather(img_flat, Hin, Win, ys, xs, m, out_dtype):
    """Bilinear sample (zero outside bounds) from a channels-last image.

    img_flat: (Hin*Win, Cin);  ys, xs, m: (P,) f32 sample coords / modulation.
    Single merged gather for the four corners.  Returns (P, Cin) in out_dtype.
    """
    f32 = jnp.float32
    y0f = jnp.floor(ys)
    x0f = jnp.floor(xs)
    y0 = y0f.astype(jnp.int32)
    x0 = x0f.astype(jnp.int32)
    y1 = y0 + 1
    x1 = x0 + 1
    ly = ys - y0f
    lx = xs - x0f
    hy = 1.0 - ly
    hx = 1.0 - lx

    # Whole sample is zero if completely outside (torchvision condition).
    valid = (ys > -1.0) & (ys < float(Hin)) & (xs > -1.0) & (xs < float(Win))

    def corner(yi, xi, w):
        ok = (yi >= 0) & (yi <= Hin - 1) & (xi >= 0) & (xi <= Win - 1)
        idx = jnp.clip(yi, 0, Hin - 1) * Win + jnp.clip(xi, 0, Win - 1)
        return idx, w * ok.astype(f32)

    i00, w00 = corner(y0, x0, hy * hx)
    i01, w01 = corner(y0, x1, hy * lx)
    i10, w10 = corner(y1, x0, ly * hx)
    i11, w11 = corner(y1, x1, ly * lx)

    idx = jnp.stack([i00, i01, i10, i11], axis=0)  # (4, P) int32
    wgt = jnp.stack([w00, w01, w10, w11], axis=0)  # (4, P) f32

    P = ys.shape[0]
    g = jnp.take(img_flat.astype(f32), idx.reshape(-1), axis=0)  # one gather HLO
    g = g.reshape(4, P, -1)
    out = (g * wgt[:, :, None]).sum(axis=0)                       # (P, Cin)
    out = out * (valid.astype(f32) * m)[:, None]
    return out.astype(out_dtype)


def _deform_im2col(x, offset, mask, kH, kW, stride, pad, dil, out_dtype):
    """Build the deformed im2col patch matrix.

    x:      (N, Cin, Hin, Win)
    offset: (N, 2*kH*kW, Hout, Wout)   channel 2k = dy, 2k+1 = dx (tap k = i*kW + j)
    mask:   (N, kH*kW, Hout, Wout)     modulation mask (DCNv2)
    Returns: patches (N*Hout*Wout, kH*kW*Cin) in out_dtype, (Hout, Wout)
    Column layout: tap-major, Cin-minor (matches weight.transpose(2,3,1,0).reshape).
    """
    N, Cin, Hin, Win = x.shape
    Hout = (Hin + 2 * pad - dil * (kH - 1) - 1) // stride + 1
    Wout = (Win + 2 * pad - dil * (kW - 1) - 1) // stride + 1
    K = kH * kW
    f32 = jnp.float32

    hs = jnp.arange(Hout, dtype=f32) * float(stride) - float(pad)   # (Hout,)
    ws = jnp.arange(Wout, dtype=f32) * float(stride) - float(pad)   # (Wout,)
    ki = jnp.arange(kH, dtype=f32) * float(dil)                     # (kH,)
    kj = jnp.arange(kW, dtype=f32) * float(dil)                     # (kW,)

    base_y = hs[:, None, None, None] + ki[None, None, :, None]      # (Hout,1,kH,1)
    base_x = ws[None, :, None, None] + kj[None, None, None, :]      # (1,Wout,1,kW)
    base_y = jnp.broadcast_to(base_y, (Hout, Wout, kH, kW)).reshape(Hout, Wout, K)
    base_x = jnp.broadcast_to(base_x, (Hout, Wout, kH, kW)).reshape(Hout, Wout, K)

    off = offset.astype(f32).reshape(N, K, 2, Hout, Wout)
    off_y = jnp.transpose(off[:, :, 0], (0, 2, 3, 1))               # (N,Hout,Wout,K)
    off_x = jnp.transpose(off[:, :, 1], (0, 2, 3, 1))
    msk = jnp.transpose(mask.astype(f32), (0, 2, 3, 1))             # (N,Hout,Wout,K)

    ys = base_y[None] + off_y
    xs = base_x[None] + off_x

    x_cl = jnp.transpose(x, (0, 2, 3, 1)).reshape(N, Hin * Win, Cin)
    P = Hout * Wout * K

    def per_batch(img_flat, ys_b, xs_b, m_b):
        v = _bilinear_gather(img_flat, Hin, Win,
                             ys_b.reshape(P), xs_b.reshape(P),
                             m_b.reshape(P), out_dtype)             # (P, Cin)
        return v.reshape(Hout * Wout, K * Cin)

    patches = jax.vmap(per_batch)(x_cl, ys, xs, msk)                # (N, Hout*Wout, K*Cin)
    return patches.reshape(N * Hout * Wout, K * Cin), (Hout, Wout)


def _round_up(a, b):
    return ((a + b - 1) // b) * b


def _choose_tm(M):
    # Row-tile size: multiple of 8, aim for >= ~4 grid tiles (both v7x TCs busy),
    # cap at 256 rows so bf16 tiles stay well inside the 32 MiB scoped VMEM.
    if M <= 8:
        return M  # full-dim block is exempt from the sublane constraint
    tm = min(256, _round_up(max(-(-M // 4), 8), 8))
    return max(tm, 8)


# ----------------------------------------------------------------------------
# Public wrapper
# ----------------------------------------------------------------------------
@functools.partial(jax.jit,
                   static_argnames=("stride", "padding", "dilation", "compute_dtype"))
def deform_conv_add_relu6_2d(x, offset, mask, x2, weight, bias, *,
                             stride=1, padding=1, dilation=1,
                             compute_dtype=jnp.bfloat16):
    """out = relu6(deform_conv2d(x, offset, mask; weight, bias) + x2)

    x:      (N, Cin, Hin, Win)       NCHW
    offset: (N, 2*kH*kW, Hout, Wout)
    mask:   (N, kH*kW, Hout, Wout)
    x2:     (N, Cout, Hout, Wout)    residual, same shape as conv output
    weight: (Cout, Cin, kH, kW)
    bias:   (Cout,)
    returns (N, Cout, Hout, Wout)  (dtype of x)
    """
    N, Cin, Hin, Win = x.shape
    Cout, Cin_w, kH, kW = weight.shape
    assert Cin_w == Cin, "groups != 1 not supported"            # TODO(synk): groups>1
    assert offset.shape[1] == 2 * kH * kW, "offset_groups != 1 not supported"
    assert mask.shape[1] == kH * kW, "offset_groups != 1 not supported"

    # --- glue: deformable bilinear sampling (one merged gather, emits bf16) ---
    patches, (Hout, Wout) = _deform_im2col(x, offset, mask, kH, kW,
                                           stride, padding, dilation, compute_dtype)
    M, K = patches.shape        # M = N*Hout*Wout, K = kH*kW*Cin  (no M/K padding)

    # --- Cout padding only when lane-dense stores are cheap (<=12.5% overhead) ---
    LANE = 128
    Cout_p = Cout
    if Cout % LANE != 0:
        cu = _round_up(Cout, LANE)
        if cu - Cout <= max(Cout // 8, 0):
            Cout_p = cu

    TM = _choose_tm(M)
    grid = (pl.cdiv(M, TM),)    # partial last block is masked by Pallas

    # weight (Cout, Cin, kH, kW) -> (kH, kW, Cin, Cout) -> (K, Cout), compute dtype
    w_mat = jnp.transpose(weight, (2, 3, 1, 0)).reshape(K, Cout).astype(compute_dtype)
    b_vec = bias.astype(jnp.float32).reshape(1, Cout)
    # residual NCHW -> (M, Cout) in compute dtype
    # TODO(synk): expose an NHWC entry/exit to drop the x2 / output transposes.
    y_mat = jnp.transpose(x2, (0, 2, 3, 1)).reshape(M, Cout).astype(compute_dtype)

    if Cout_p != Cout:
        w_mat = jnp.pad(w_mat, ((0, 0), (0, Cout_p - Cout)))
        b_vec = jnp.pad(b_vec, ((0, 0), (0, Cout_p - Cout)))
        y_mat = jnp.pad(y_mat, ((0, 0), (0, Cout_p - Cout)))

    out_p = pl.pallas_call(
        _fused_matmul_add_relu6_kernel,
        out_shape=jax.ShapeDtypeStruct((M, Cout_p), x.dtype),
        grid_spec=pltpu.PrefetchScalarGridSpec(
            num_scalar_prefetch=0,
            grid=grid,
            in_specs=[
                pl.BlockSpec((TM, K), lambda i: (i, 0)),         # patches tile (full K)
                pl.BlockSpec((K, Cout_p), lambda i: (0, 0)),     # full weight (resident)
                pl.BlockSpec((1, Cout_p), lambda i: (0, 0)),     # bias
                pl.BlockSpec((TM, Cout_p), lambda i: (i, 0)),    # residual tile
            ],
            out_specs=pl.BlockSpec((TM, Cout_p), lambda i: (i, 0)),
        ),
        compiler_params=pltpu.CompilerParams(
            dimension_semantics=("parallel",)),   # shards M tiles across 2 TCs on v7x
    )(patches, w_mat, b_vec, y_mat)

    out = out_p if Cout_p == Cout else out_p[:, :Cout]
    out = out.reshape(N, Hout, Wout, Cout)
    return jnp.transpose(out, (0, 3, 1, 2))


# ----------------------------------------------------------------------------
# Pure-JAX references for correctness checks
# ----------------------------------------------------------------------------
def _plain_conv_add_relu6_ref(x, weight, bias, x2, stride, padding, dilation):
    out = jax.lax.conv_general_dilated(
        x, weight,
        window_strides=(stride, stride),
        padding=[(padding, padding)] * 2,
        rhs_dilation=(dilation, dilation),
        dimension_numbers=("NCHW", "OIHW", "NCHW"))
    out = out + bias.reshape(1, -1, 1, 1) + x2
    return jnp.clip(out, 0.0, 6.0)


def _deform_conv_add_relu6_ref(x, offset, mask, x2, weight, bias,
                               stride, padding, dilation):
    # Non-Pallas f32 reference (XLA matmul) for the deformable path.
    N, Cin, Hin, Win = x.shape
    Cout, _, kH, kW = weight.shape
    patches, (Hout, Wout) = _deform_im2col(x, offset, mask, kH, kW,
                                           stride, padding, dilation, jnp.float32)
    w_mat = jnp.transpose(weight, (2, 3, 1, 0)).reshape(kH * kW * Cin, Cout)
    out = patches @ w_mat + bias[None, :]
    out = jnp.transpose(out.reshape(N, Hout, Wout, Cout), (0, 3, 1, 2)) + x2
    return jnp.clip(out, 0.0, 6.0)


# ----------------------------------------------------------------------------
# Demo / self-test
# ----------------------------------------------------------------------------
if __name__ == "__main__":
    key = jax.random.PRNGKey(0)
    k_x, k_w, k_b, k_off, k_m, k_y = jax.random.split(key, 6)

    # Small shapes: N=2, Cin=4, spatial 16x20, Cout=8, 3x3 deformable kernel.
    N, Cin, Hin, Win = 2, 4, 16, 20
    Cout, kH, kW = 8, 3, 3
    stride, pad, dil = 1, 1, 1
    Hout = (Hin + 2 * pad - dil * (kH - 1) - 1) // stride + 1
    Wout = (Win + 2 * pad - dil * (kW - 1) - 1) // stride + 1

    x = jax.random.normal(k_x, (N, Cin, Hin, Win), dtype=jnp.float32)
    weight = jax.random.normal(k_w, (Cout, Cin, kH, kW), dtype=jnp.float32) * 0.1
    bias = jax.random.normal(k_b, (Cout,), dtype=jnp.float32) * 0.1
    offset = jax.random.normal(k_off, (N, 2 * kH * kW, Hout, Wout), dtype=jnp.float32) * 2.0
    mask = jax.nn.sigmoid(jax.random.normal(k_m, (N, kH * kW, Hout, Wout), dtype=jnp.float32))
    x2 = jax.random.normal(k_y, (N, Cout, Hout, Wout), dtype=jnp.float32)

    # Test 1: zero offsets + unit mask == plain Conv2d + add + ReLU6 (f32 compute path).
    out0 = deform_conv_add_relu6_2d(
        x, jnp.zeros_like(offset), jnp.ones_like(mask), x2, weight, bias,
        stride=stride, padding=pad, dilation=dil, compute_dtype=jnp.float32)
    out0 = jax.block_until_ready(out0)
    ref0 = jax.block_until_ready(
        _plain_conv_add_relu6_ref(x, weight, bias, x2, stride, pad, dil))
    assert out0.shape == ref0.shape, (out0.shape, ref0.shape)
    err0 = float(jnp.max(jnp.abs(out0 - ref0)))
    assert err0 < 5e-2, err0

    # Test 2: random offsets / modulation mask vs pure-JAX deformable ref (f32 path).
    ref = jax.block_until_ready(
        _deform_conv_add_relu6_ref(x, offset, mask, x2, weight, bias, stride, pad, dil))
    out_f32 = deform_conv_add_relu6_2d(
        x, offset, mask, x2, weight, bias,
        stride=stride, padding=pad, dilation=dil, compute_dtype=jnp.float32)
    out_f32 = jax.block_until_ready(out_f32)
    assert out_f32.shape == ref.shape, (out_f32.shape, ref.shape)
    err_f32 = float(jnp.max(jnp.abs(out_f32 - ref)))
    assert err_f32 < 5e-2, err_f32

    # Test 3: default bf16 compute path (perf config) vs f32 reference, looser tol.
    out_bf16 = deform_conv_add_relu6_2d(
        x, offset, mask, x2, weight, bias,
        stride=stride, padding=pad, dilation=dil)   # compute_dtype=bf16 default
    out_bf16 = jax.block_until_ready(out_bf16)
    assert out_bf16.shape == ref.shape, (out_bf16.shape, ref.shape)
    err_bf16 = float(jnp.max(jnp.abs(out_bf16 - ref)))
    assert err_bf16 < 1.5e-1, err_bf16

    print("KERNEL_OK")
</pallas_src>

<mosaic_0001>
module attributes {stable_mosaic.version = 11 : i64} {
  func.func @_fused_matmul_add_relu6_kernel(%arg0: i32, %arg1: memref<160x36xf32, #tpu.memory_space<vmem>>, %arg2: memref<36x8xf32, #tpu.memory_space<vmem>>, %arg3: memref<1x8xf32, #tpu.memory_space<vmem>>, %arg4: memref<160x8xf32, #tpu.memory_space<vmem>>, %arg5: memref<160x8xf32, #tpu.memory_space<vmem>>) attributes {dimension_semantics = [#tpu.dimension_semantics<parallel>], iteration_bounds = array<i64: 4>, scalar_prefetch = 0 : i64, scratch_operands = 0 : i64, tpu.core_type = #tpu.core_type<tc>, window_params = [{transform_indices = @transform_0, window_bounds = array<i64: 160, 36>}, {pipeline_mode = #tpu.pipeline_mode<synchronous>, transform_indices = @transform_1, window_bounds = array<i64: 36, 8>}, {pipeline_mode = #tpu.pipeline_mode<synchronous>, transform_indices = @transform_2, window_bounds = array<i64: 1, 8>}, {transform_indices = @transform_3, window_bounds = array<i64: 160, 8>}, {transform_indices = @transform_4, window_bounds = array<i64: 160, 8>}]} {
    %c0 = arith.constant 0 : index
    %c0_0 = arith.constant 0 : index
    %0 = vector.load %arg1[%c0, %c0_0] : memref<160x36xf32, #tpu.memory_space<vmem>>, vector<160x36xf32>
    %c0_1 = arith.constant 0 : index
    %c0_2 = arith.constant 0 : index
    %1 = vector.load %arg2[%c0_1, %c0_2] : memref<36x8xf32, #tpu.memory_space<vmem>>, vector<36x8xf32>
    %cst = arith.constant dense<0.000000e+00> : vector<160x8xf32>
    %2 = tpu.matmul %0, %1, %cst {dimension_numbers = #tpu.dot_dimension_numbers<[1], [0], [0], [1], [0, 0, 1, 1], [], []>} : vector<160x36xf32>, vector<36x8xf32>, vector<160x8xf32> -> vector<160x8xf32>
    %c0_3 = arith.constant 0 : index
    %c0_4 = arith.constant 0 : index
    %3 = vector.load %arg3[%c0_3, %c0_4] : memref<1x8xf32, #tpu.memory_space<vmem>>, vector<1x8xf32>
    %4 = vector.broadcast %3 : vector<1x8xf32> to vector<160x8xf32>
    %5 = arith.addf %2, %4 : vector<160x8xf32>
    %c0_5 = arith.constant 0 : index
    %c0_6 = arith.constant 0 : index
    %6 = vector.load %arg4[%c0_5, %c0_6] : memref<160x8xf32, #tpu.memory_space<vmem>>, vector<160x8xf32>
    %7 = arith.addf %5, %6 : vector<160x8xf32>
    %cst_7 = arith.constant 0.000000e+00 : f32
    %8 = vector.broadcast %cst_7 : f32 to vector<160x8xf32>
    %9 = arith.maximumf %7, %8 : vector<160x8xf32>
    %cst_8 = arith.constant 6.000000e+00 : f32
    %10 = vector.broadcast %cst_8 : f32 to vector<160x8xf32>
    %11 = arith.minimumf %9, %10 : vector<160x8xf32>
    %c0_9 = arith.constant 0 : index
    %c0_10 = arith.constant 0 : index
    %12 = vector.load %arg5[%c0_9, %c0_10] : memref<160x8xf32, #tpu.memory_space<vmem>>, vector<160x8xf32>
    tpu.vector_store %arg5[%c0_9, %c0_10], %11 {strides = array<i32>} : memref<160x8xf32, #tpu.memory_space<vmem>>, vector<160x8xf32>,
    return
  }
  func.func @transform_0(%arg0: i32) -> (i32, i32) {
    %c0_i32 = arith.constant 0 : i32
    %c0_i32_0 = arith.constant 0 : i32
    return %arg0, %c0_i32 : i32, i32
  }
  func.func @transform_1(%arg0: i32) -> (i32, i32) {
    %c0_i32 = arith.constant 0 : i32
    %c0_i32_0 = arith.constant 0 : i32
    %c0_i32_1 = arith.constant 0 : i32
    return %c0_i32, %c0_i32_0 : i32, i32
  }
  func.func @transform_2(%arg0: i32) -> (i32, i32) {
    %c0_i32 = arith.constant 0 : i32
    %c0_i32_0 = arith.constant 0 : i32
    %c0_i32_1 = arith.constant 0 : i32
    return %c0_i32, %c0_i32_0 : i32, i32
  }
  func.func @transform_3(%arg0: i32) -> (i32, i32) {
    %c0_i32 = arith.constant 0 : i32
    %c0_i32_0 = arith.constant 0 : i32
    return %arg0, %c0_i32 : i32, i32
  }
  func.func @transform_4(%arg0: i32) -> (i32, i32) {
    %c0_i32 = arith.constant 0 : i32
    %c0_i32_0 = arith.constant 0 : i32
    return %arg0, %c0_i32 : i32, i32
  }
}

</mosaic_0001>

<bundles_post_ra>
// kernel: deform_conv_add_relu6_2d.1
= control target key start
LH: loop header
LB: loop body
LE: loop exit
PB: predicated region body
PF: predicated region fallthrough
CT: control target
= control target key end

     0   :  { %s651_s15 = smov 0   ;;  %s822_s0 = inlined_call_operand.vmem [shape: f32[640,36], index: 0, kind: input, shape index: {}]   ;;  %s823_s1 = inlined_call_operand.vmem [shape: f32[36,8], index: 1, kind: input, shape index: {}]   ;;  %s824_s2 = inlined_call_operand.vmem [shape: f32[1,8], index: 2, kind: input, shape index: {}]   ;;  %s825_s3 = inlined_call_operand.vmem [shape: f32[640,8], index: 3, kind: input, shape index: {}]   ;;  %s826_s4 = inlined_call_operand.vmem [shape: f32[640,8], index: 4, kind: output, shape index: {}]  }
   0x1 LB: > { %s563_s16 = sadd.s32 4294967295, %s624_s15   ;;  %p567_p0 = scmp.ge.s32.totalorder %s624_s15, 1  ;;  %s624_s15 = sphi %s651_s15, %s14_s15  }
   0x2   : > { %p174_p1 = scmp.lt.s32.totalorder %s624_s15, 5 }
   0x4   : > { %p175_p2 = pnand %p567_p0, %p174_p1 }
   0x5   : > { %s205_s21 = smul.u32 (!%p175_p2), 20, %s563_s16 }
   0x6   : > { %178 = sbr.rel (%p175_p2) target bundleno = 195 (0xc3), region = 36 }
   0x7   : > { %p206_p3 = scmp.lt.s32.totalorder (!%p175_p2), %s205_s21, 79 }
   0xb   : > { %v247_v0 = vld [vmem:[%s823_s1 + $0x20] sm:$0xf]  ;;  %vm313_vm0 = vcmask 1043456   ;;  %v246_v1 = vld [vmem:[%s823_s1 + $0x18] sm:$0xff]  ;;  %v245_v2 = vld [vmem:[%s823_s1 + $0x10] sm:$0xff]  ;;  %s828_s21 = smov (!%p206_p3, %s205_s21), 79 }
   0xc   : > { %595 = vmatpush.msk.msra.mxu2 %vm313_vm0, %v247_v0  ;;  %596 = vmatpush.msk.msra.mxu3 %vm313_vm0, %v247_v0  ;;  %v244_v3 = vld [vmem:[%s823_s1 + $0x8] sm:$0xff]  ;;  %v243_v4 = vld [vmem:[%s823_s1] sm:$0xff]  ;;  %s674_s28 = sshll.u32 %s828_s21, 3  ;;  %vm252_vm1 = vcmask 293888   ;;  %vm474_vm2 = vcmask 64512  }
   0xd   : > { %571 = vmatpush.msk.msra.mxu0 %vm313_vm0, %v247_v0  ;;  %594 = vmatpush.msk.msra.mxu1 %vm313_vm0, %v247_v0  ;;  %s680_s5 = scalar_lea.vmem %s822_s0, %s674_s28  ;;  %s726_s8 = scalar_lea.vmem %s825_s3, %s674_s28  ;;  %v731_v25 = vld [vmem:[%s824_s2] ss:$0 sm:$0xff] }
   0xe   : > { %598 = vmatpush.msra.mxu2 %v246_v1  ;;  %599 = vmatpush.msra.mxu3 %v246_v1  ;;  %v233_v5 = vld [vmem:[%s680_s5 + $0x50] sm:$0xff]  ;;  %v238_v6 = vld [vmem:[%s680_s5 + $0x78] sm:$0xff]  ;;  %v223_v7 = vld [vmem:[%s680_s5] sm:$0xff]  ;;  %s745_s13 = scalar_lea.vmem %s826_s4, %s674_s28 }
   0xf   : > { %329 = vmatpush.msra.mxu0 %v246_v1  ;;  %597 = vmatpush.msra.mxu1 %v246_v1  ;;  %v228_v8 = vld [vmem:[%s680_s5 + $0x28] sm:$0xff]  ;;  %v234_v9 = vld [vmem:[%s680_s5 + $0x58] sm:$0xff]  ;;  %v239_v10 = vld [vmem:[%s680_s5 + $0x80] sm:$0xff] }
  0x10   : > { %601 = vmatpush.msra.mxu2 %v245_v2  ;;  %602 = vmatpush.msra.mxu3 %v245_v2  ;;  %v224_v11 = vld [vmem:[%s680_s5 + $0x8] sm:$0xff]  ;;  %v229_v12 = vld [vmem:[%s680_s5 + $0x30] sm:$0xff]  ;;  %v235_v13 = vld [vmem:[%s680_s5 + $0x60] sm:$0xff] }
  0x11   : > { %330 = vmatpush.msra.mxu0 %v245_v2  ;;  %600 = vmatpush.msra.mxu1 %v245_v2  ;;  %v240_v14 = vld [vmem:[%s680_s5 + $0x88] sm:$0xff]  ;;  %v225_v15 = vld [vmem:[%s680_s5 + $0x10] sm:$0xff]  ;;  %v230_v16 = vld [vmem:[%s680_s5 + $0x38] sm:$0xff] }
  0x12   : > { %604 = vmatpush.msra.mxu2 %v244_v3  ;;  %605 = vmatpush.msra.mxu3 %v244_v3  ;;  %v236_v17 = vld [vmem:[%s680_s5 + $0x68] sm:$0xff]  ;;  %v241_v18 = vld [vmem:[%s680_s5 + $0x90] sm:$0xff]  ;;  %v226_v19 = vld [vmem:[%s680_s5 + $0x18] sm:$0xff] }
  0x13   : > { %331 = vmatpush.msra.mxu0 %v244_v3  ;;  %603 = vmatpush.msra.mxu1 %v244_v3  ;;  %v231_v20 = vld [vmem:[%s680_s5 + $0x40] sm:$0xff]  ;;  %v237_v21 = vld [vmem:[%s680_s5 + $0x70] sm:$0xff]  ;;  %v242_v22 = vld [vmem:[%s680_s5 + $0x98] sm:$0xff] }
  0x14   : > { %607 = vmatpush.msra.mxu2 %v243_v4  ;;  %608 = vmatpush.msra.mxu3 %v243_v4  ;;  %v227_v23 = vld [vmem:[%s680_s5 + $0x20] sm:$0xff]  ;;  %v232_v24 = vld [vmem:[%s680_s5 + $0x48] sm:$0xff]  ;;  %v404_v35 = vld [vmem:[%s726_s8 + $0x50] sm:$0xff] }
  0x15   : > { %582 = vmatmul.msk.f32.vlgmr.msra.gmra.mxu2 %vm252_vm1, %v233_v5  ;;  %587 = vmatmul.msk.f32.vlgmr.msra.gmra.mxu3 %vm252_vm1, %v238_v6  ;;  %v394_v27 = vld [vmem:[%s726_s8] sm:$0xff]  ;;  %v399_v29 = vld [vmem:[%s726_s8 + $0x28] sm:$0xff]  ;;  %v409_v37 = vld [vmem:[%s726_s8 + $0x78] sm:$0xff] }
  0x16   : > { %332 = vmatpush.msra.mxu0 %v243_v4  ;;  %606 = vmatpush.msra.mxu1 %v243_v4  ;;  %v395_v47 = vld [vmem:[%s726_s8 + $0x8] sm:$0xff]  ;;  %v400_v49 = vld [vmem:[%s726_s8 + $0x30] sm:$0xff]  ;;  %v405_v59 = vld [vmem:[%s726_s8 + $0x58] sm:$0xff] }
  0x17   : > { %572 = vmatmul.msk.f32.vlgmr.msra.gmra.mxu0 %vm252_vm1, %v223_v7  ;;  %577 = vmatmul.msk.f32.vlgmr.msra.gmra.mxu1 %vm252_vm1, %v228_v8  ;;  %v410_v61 = vld [vmem:[%s726_s8 + $0x80] sm:$0xff]  ;;  %v396_v7 = vld [vmem:[%s726_s8 + $0x10] sm:$0xff] }
  0x1d   : > { %583 = vmatmul.msk.f32.gmra.mxu2 %vm252_vm1, %v234_v9  ;;  %588 = vmatmul.msk.f32.gmra.mxu3 %vm252_vm1, %v239_v10  ;;  %v401_v9 = vld [vmem:[%s726_s8 + $0x38] sm:$0xff] }
  0x1f   : > { %573 = vmatmul.msk.f32.gmra.mxu0 %vm252_vm1, %v224_v11  ;;  %578 = vmatmul.msk.f32.gmra.mxu1 %vm252_vm1, %v229_v12 }
  0x25   : > { %584 = vmatmul.msk.f32.gmra.mxu2 %vm252_vm1, %v235_v13  ;;  %589 = vmatmul.msk.f32.gmra.mxu3 %vm252_vm1, %v240_v14 }
  0x27   : > { %574 = vmatmul.msk.f32.gmra.mxu0 %vm252_vm1, %v225_v15  ;;  %579 = vmatmul.msk.f32.gmra.mxu1 %vm252_vm1, %v230_v16 }
  0x2d   : > { %585 = vmatmul.msk.f32.gmra.mxu2 %vm252_vm1, %v236_v17  ;;  %590 = vmatmul.msk.f32.gmra.mxu3 %vm252_vm1, %v241_v18 }
  0x2f   : > { %575 = vmatmul.msk.f32.gmra.mxu0 %vm252_vm1, %v226_v19  ;;  %580 = vmatmul.msk.f32.gmra.mxu1 %vm252_vm1, %v231_v20  ;;  %v406_v19 = vld [vmem:[%s726_s8 + $0x60] sm:$0xff] }
  0x35   : > { %586 = vmatmul.msk.f32.gmra.mxu2 %vm252_vm1, %v237_v21  ;;  %591 = vmatmul.msk.f32.gmra.mxu3 %vm252_vm1, %v242_v22  ;;  %v411_v21 = vld [vmem:[%s726_s8 + $0x88] sm:$0xff] }
  0x37   : > { %576 = vmatmul.msk.f32.gmra.mxu0 %vm252_vm1, %v227_v23  ;;  %581 = vmatmul.msk.f32.gmra.mxu1 %vm252_vm1, %v232_v24 }
  0x94   : > { %v334_v26 = vpop.f32.mrf.mxu0  ;;  %v349_v28 = vpop.f32.mrf.mxu1 }
  0x95   : > { %v335_v30 = vadd.f32 %v731_v25, %v334_v26  ;;  %v350_v31 = vadd.f32 %v731_v25, %v349_v28 }
  0x97   : > { %v414_v32 = vadd.f32 %v394_v27, %v335_v30  ;;  %v419_v33 = vadd.f32 %v399_v29, %v350_v31 }
  0x98   : > { %v364_v34 = vpop.f32.mrf.mxu2  ;;  %v379_v36 = vpop.f32.mrf.mxu3 }
  0x99   : > { %v434_v38 = vmax.f32 %v414_v32, 0.0  ;;  %v439_v39 = vmax.f32 %v419_v33, 0.0  ;;  %v365_v40 = vadd.f32 %v731_v25, %v364_v34  ;;  %v380_v41 = vadd.f32 %v731_v25, %v379_v36  ;;  %v397_v32 = vld [vmem:[%s726_s8 + $0x18] sm:$0xff]  ;;  %v402_v34 = vld [vmem:[%s726_s8 + $0x40] sm:$0xff] }
  0x9b   : > { %v454_v42 = vmin.f32 %v434_v38, 6.0  ;;  %v459_v43 = vmin.f32 %v439_v39, 6.0  ;;  %v424_v44 = vadd.f32 %v404_v35, %v365_v40  ;;  %v429_v45 = vadd.f32 %v409_v37, %v380_v41 }
  0x9c   : > { %v337_v46 = vpop.f32.mrf.mxu0  ;;  %v352_v48 = vpop.f32.mrf.mxu1 }
  0x9d   : > { %475 = vst.msk [vmem:[%s745_s13] sm:$0xff] %vm474_vm2, %v454_v42  ;;  %v444_v50 = vmax.f32 %v424_v44, 0.0  ;;  %v449_v51 = vmax.f32 %v429_v45, 0.0  ;;  %v338_v52 = vadd.f32 %v731_v25, %v337_v46  ;;  %v353_v53 = vadd.f32 %v731_v25, %v352_v48  ;;  %v407_v44 = vld [vmem:[%s726_s8 + $0x68] sm:$0xff]  ;;  %v412_v46 = vld [vmem:[%s726_s8 + $0x90] sm:$0xff] }
  0x9e   : > { %480 = vst.msk [vmem:[%s745_s13 + $0x28] sm:$0xff] %vm474_vm2, %v459_v43 }
  0x9f   : > { %v464_v54 = vmin.f32 %v444_v50, 6.0  ;;  %v469_v55 = vmin.f32 %v449_v51, 6.0  ;;  %v415_v56 = vadd.f32 %v395_v47, %v338_v52  ;;  %v420_v57 = vadd.f32 %v400_v49, %v353_v53 }
  0xa0   : > { %v367_v58 = vpop.f32.mrf.mxu2  ;;  %v382_v60 = vpop.f32.mrf.mxu3 }
  0xa1   : > { %485 = vst.msk [vmem:[%s745_s13 + $0x50] sm:$0xff] %vm474_vm2, %v464_v54  ;;  %v435_v62 = vmax.f32 %v415_v56, 0.0  ;;  %v440_v63 = vmax.f32 %v420_v57, 0.0  ;;  %v368_v0 = vadd.f32 %v731_v25, %v367_v58  ;;  %v383_v1 = vadd.f32 %v731_v25, %v382_v60  ;;  %v398_v56 = vld [vmem:[%s726_s8 + $0x20] sm:$0xff]  ;;  %v403_v58 = vld [vmem:[%s726_s8 + $0x48] sm:$0xff] }
  0xa2   : > { %490 = vst.msk [vmem:[%s745_s13 + $0x78] sm:$0xff] %vm474_vm2, %v469_v55 }
  0xa3   : > { %v455_v2 = vmin.f32 %v435_v62, 6.0  ;;  %v460_v3 = vmin.f32 %v440_v63, 6.0  ;;  %v425_v4 = vadd.f32 %v405_v59, %v368_v0  ;;  %v430_v5 = vadd.f32 %v410_v61, %v383_v1 }
  0xa4   : > { %v340_v6 = vpop.f32.mrf.mxu0  ;;  %v355_v8 = vpop.f32.mrf.mxu1 }
  0xa5   : > { %476 = vst.msk [vmem:[%s745_s13 + $0x8] sm:$0xff] %vm474_vm2, %v455_v2  ;;  %v445_v10 = vmax.f32 %v425_v4, 0.0  ;;  %v450_v11 = vmax.f32 %v430_v5, 0.0  ;;  %v341_v12 = vadd.f32 %v731_v25, %v340_v6  ;;  %v356_v13 = vadd.f32 %v731_v25, %v355_v8  ;;  %v408_v4 = vld [vmem:[%s726_s8 + $0x70] sm:$0xff]  ;;  %v413_v6 = vld [vmem:[%s726_s8 + $0x98] sm:$0xff] }
  0xa6   : > { %481 = vst.msk [vmem:[%s745_s13 + $0x30] sm:$0xff] %vm474_vm2, %v460_v3 }
  0xa7   : > { %v465_v14 = vmin.f32 %v445_v10, 6.0  ;;  %v470_v15 = vmin.f32 %v450_v11, 6.0  ;;  %v416_v16 = vadd.f32 %v396_v7, %v341_v12  ;;  %v421_v17 = vadd.f32 %v401_v9, %v356_v13 }
  0xa8   : > { %v370_v18 = vpop.f32.mrf.mxu2  ;;  %v385_v20 = vpop.f32.mrf.mxu3 }
  0xa9   : > { %486 = vst.msk [vmem:[%s745_s13 + $0x58] sm:$0xff] %vm474_vm2, %v465_v14  ;;  %v436_v22 = vmax.f32 %v416_v16, 0.0  ;;  %v441_v23 = vmax.f32 %v421_v17, 0.0  ;;  %v371_v24 = vadd.f32 %v731_v25, %v370_v18  ;;  %v386_v26 = vadd.f32 %v731_v25, %v385_v20 }
  0xaa   : > { %491 = vst.msk [vmem:[%s745_s13 + $0x80] sm:$0xff] %vm474_vm2, %v470_v15 }
  0xab   : > { %v456_v27 = vmin.f32 %v436_v22, 6.0  ;;  %v461_v28 = vmin.f32 %v441_v23, 6.0  ;;  %v426_v29 = vadd.f32 %v406_v19, %v371_v24  ;;  %v431_v30 = vadd.f32 %v411_v21, %v386_v26 }
  0xac   : > { %v343_v31 = vpop.f32.mrf.mxu0  ;;  %v358_v33 = vpop.f32.mrf.mxu1 }
  0xad   : > { %477 = vst.msk [vmem:[%s745_s13 + $0x10] sm:$0xff] %vm474_vm2, %v456_v27  ;;  %v446_v35 = vmax.f32 %v426_v29, 0.0  ;;  %v451_v36 = vmax.f32 %v431_v30, 0.0  ;;  %v344_v37 = vadd.f32 %v731_v25, %v343_v31  ;;  %v359_v38 = vadd.f32 %v731_v25, %v358_v33 }
  0xae   : > { %482 = vst.msk [vmem:[%s745_s13 + $0x38] sm:$0xff] %vm474_vm2, %v461_v28 }
  0xaf   : > { %v466_v39 = vmin.f32 %v446_v35, 6.0  ;;  %v471_v40 = vmin.f32 %v451_v36, 6.0  ;;  %v417_v41 = vadd.f32 %v397_v32, %v344_v37  ;;  %v422_v42 = vadd.f32 %v402_v34, %v359_v38 }
  0xb0   : > { %v373_v43 = vpop.f32.mrf.mxu2  ;;  %v388_v45 = vpop.f32.mrf.mxu3 }
  0xb1   : > { %487 = vst.msk [vmem:[%s745_s13 + $0x60] sm:$0xff] %vm474_vm2, %v466_v39  ;;  %v437_v47 = vmax.f32 %v417_v41, 0.0  ;;  %v442_v48 = vmax.f32 %v422_v42, 0.0  ;;  %v374_v49 = vadd.f32 %v731_v25, %v373_v43  ;;  %v389_v50 = vadd.f32 %v731_v25, %v388_v45 }
  0xb2   : > { %492 = vst.msk [vmem:[%s745_s13 + $0x88] sm:$0xff] %vm474_vm2, %v471_v40 }
  0xb3   : > { %v457_v51 = vmin.f32 %v437_v47, 6.0  ;;  %v462_v52 = vmin.f32 %v442_v48, 6.0  ;;  %v427_v53 = vadd.f32 %v407_v44, %v374_v49  ;;  %v432_v54 = vadd.f32 %v412_v46, %v389_v50 }
  0xb4   : > { %v346_v55 = vpop.f32.mrf.mxu0  ;;  %v361_v57 = vpop.f32.mrf.mxu1 }
  0xb5   : > { %478 = vst.msk [vmem:[%s745_s13 + $0x18] sm:$0xff] %vm474_vm2, %v457_v51  ;;  %v447_v59 = vmax.f32 %v427_v53, 0.0  ;;  %v452_v60 = vmax.f32 %v432_v54, 0.0  ;;  %v347_v61 = vadd.f32 %v731_v25, %v346_v55  ;;  %v362_v62 = vadd.f32 %v731_v25, %v361_v57 }
  0xb6   : > { %483 = vst.msk [vmem:[%s745_s13 + $0x40] sm:$0xff] %vm474_vm2, %v462_v52 }
  0xb7   : > { %v467_v63 = vmin.f32 %v447_v59, 6.0  ;;  %v472_v0 = vmin.f32 %v452_v60, 6.0  ;;  %v418_v1 = vadd.f32 %v398_v56, %v347_v61  ;;  %v423_v2 = vadd.f32 %v403_v58, %v362_v62 }
  0xb8   : > { %v376_v3 = vpop.f32.mrf.mxu2  ;;  %v391_v5 = vpop.f32.mrf.mxu3 }
  0xb9   : > { %488 = vst.msk [vmem:[%s745_s13 + $0x68] sm:$0xff] %vm474_vm2, %v467_v63  ;;  %v438_v7 = vmax.f32 %v418_v1, 0.0  ;;  %v443_v8 = vmax.f32 %v423_v2, 0.0  ;;  %v377_v9 = vadd.f32 %v731_v25, %v376_v3  ;;  %v392_v10 = vadd.f32 %v731_v25, %v391_v5 }
  0xba   : > { %493 = vst.msk [vmem:[%s745_s13 + $0x90] sm:$0xff] %vm474_vm2, %v472_v0 }
  0xbb   : > { %v458_v11 = vmin.f32 %v438_v7, 6.0  ;;  %v463_v12 = vmin.f32 %v443_v8, 6.0  ;;  %v428_v13 = vadd.f32 %v408_v4, %v377_v9  ;;  %v433_v14 = vadd.f32 %v413_v6, %v392_v10 }
  0xbd   : > { %479 = vst.msk [vmem:[%s745_s13 + $0x20] sm:$0xff] %vm474_vm2, %v458_v11  ;;  %v448_v15 = vmax.f32 %v428_v13, 0.0  ;;  %v453_v16 = vmax.f32 %v433_v14, 0.0 }
  0xbe   : > { %484 = vst.msk [vmem:[%s745_s13 + $0x48] sm:$0xff] %vm474_vm2, %v463_v12 }
  0xbf   : > { %v468_v17 = vmin.f32 %v448_v15, 6.0  ;;  %v473_v18 = vmin.f32 %v453_v16, 6.0 }
  0xc1   : > { %489 = vst.msk [vmem:[%s745_s13 + $0x70] sm:$0xff] %vm474_vm2, %v468_v17 }
  0xc2   : > { %494 = vst.msk [vmem:[%s745_s13 + $0x98] sm:$0xff] %vm474_vm2, %v473_v18 }
  0xc3 PF: > { %s14_s15 = sadd.s32 1, %s624_s15  }
  0xc4   : > { %p11_p4 = scmp.ge.s32.totalorder %s14_s15, 6  }
  0xc6   :  { %13 = sbr.rel (!%p11_p4) target bundleno = 1 (0x1), region = 69 }

</bundles_post_ra>
